<compile_context>
chip_gen: v7x
topology: tpu7x:2x2x1
jax: 0.10.0
libtpu: 0.0.40
codegen_flags: <defaults>
</compile_context>

<pallas_src>
import functools
import math

import jax
import jax.numpy as jnp
from jax.experimental import pallas as pl
from jax.experimental.pallas import tpu as pltpu


def _round_up(n: int, m: int) -> int:
    return ((n + m - 1) // m) * m


def _normed_log(x):
    # TODO(synk): normed_log() is referenced by the PyTorch module but not
    # defined in the provided spec; log1p is a placeholder. The demo runs with
    # use_log=False so the kernel semantics match the reference exactly.
    return jnp.log1p(x)


def _fourier_proj_kernel(x_ref, freq_ref, w_ref, b_ref, o_ref):
    # x_ref    : (TB, 1)   f32  abundance values for this row block
    # freq_ref : (1, F)    f32  learned frequencies (VMEM-resident)
    # w_ref    : (2F, E)   f32  proj weight^T pre-scaled by 1/sqrt(2F); rows = [cos | sin]
    # b_ref    : (1, E)    f32  proj bias (VMEM-resident)
    # o_ref    : (TB, E)   f32  output block
    angles = x_ref[...] * freq_ref[...]                  # (TB, F) outer product (VPU)
    feats = jnp.concatenate(                             # (TB, 2F), cat order = [cos, sin]
        [jnp.cos(angles), jnp.sin(angles)], axis=-1)
    acc = jnp.dot(feats, w_ref[...],                     # single MXU matmul, f32 accumulate
                  preferred_element_type=jnp.float32,
                  precision=jax.lax.Precision.HIGHEST)
    o_ref[...] = (acc + b_ref[...]).astype(o_ref.dtype)


@functools.partial(jax.jit, static_argnames=("use_log", "block_rows"))
def abundance_encoder_learned_fourier(x, freq, w, b, *, use_log=False, block_rows=2048):
    """Pallas equivalent of AbundanceEncoder_LearnedFourier.forward.

    x    : abundance values, shape [*] or [*, 1] (rank-0 allowed).
    freq : [num_frequencies, 1] learned frequencies (nn.Parameter layout).
    w, b : nn.Linear(2F, encode_dim) weight [E, 2F] and bias [E].
    Returns [*, encode_dim] (or [encode_dim] for 1-element degenerate inputs,
    matching PyTorch's matmul broadcasting).
    """
    x = jnp.asarray(x, jnp.float32)
    if use_log:
        x = _normed_log(x)
    if x.ndim == 0:
        x = x[None]
    if x.shape[-1] != 1:
        x = x[..., None]

    lead_shape = x.shape[:-1]
    flat = jnp.reshape(x, (-1, 1))
    n = flat.shape[0]

    num_freq = freq.shape[0]
    encode_dim = w.shape[0]
    scale = 1.0 / math.sqrt(2 * num_freq)

    freq_row = jnp.reshape(freq.astype(jnp.float32), (1, num_freq))
    # Transposed weight (2F, E) with the normalization folded in:
    #   (feats * scale) @ W^T  ==  feats @ (W^T * scale)
    w_t = jnp.transpose(w.astype(jnp.float32)) * scale
    b_row = jnp.reshape(b.astype(jnp.float32), (1, encode_dim))

    # Row block: multiple of 8 sublanes (unmasked f32 sublane stores), large
    # enough to amortize per-grid-step overhead, capped at 4096 so VMEM stays
    # comfortably inside v7x's scoped limit, and capped at ~n/4 so the grid
    # keeps >= 4 steps (megacore sharding on v7x).
    tb = max(8, min(min(block_rows, 4096), _round_up(pl.cdiv(n, 4), 8)))
    tb = min(tb, _round_up(n, 8))
    grid = pl.cdiv(n, tb)
    # Ragged tail: Pallas clips the last block at the array boundary, so no
    # wrapper-side jnp.pad of x and no out[:n] slice copy are needed.

    cost = pl.CostEstimate(
        flops=2 * n * (2 * num_freq) * encode_dim,
        transcendentals=2 * n * num_freq,
        bytes_accessed=4 * (n + n * encode_dim
                            + 2 * num_freq * encode_dim + num_freq + encode_dim),
    )

    out = pl.pallas_call(
        _fourier_proj_kernel,
        out_shape=jax.ShapeDtypeStruct((n, encode_dim), jnp.float32),
        grid_spec=pltpu.PrefetchScalarGridSpec(
            num_scalar_prefetch=0,
            grid=(grid,),
            in_specs=[
                pl.BlockSpec((tb, 1), lambda i: (i, 0)),                     # x rows
                pl.BlockSpec((1, num_freq), lambda i: (0, 0)),               # freq (resident)
                pl.BlockSpec((2 * num_freq, encode_dim), lambda i: (0, 0)),  # W^T*scale (resident)
                pl.BlockSpec((1, encode_dim), lambda i: (0, 0)),             # bias (resident)
            ],
            out_specs=pl.BlockSpec((tb, encode_dim), lambda i: (i, 0)),
        ),
        compiler_params=pltpu.CompilerParams(
            dimension_semantics=("parallel",),
        ),
        cost_estimate=cost,
    )(flat, freq_row, w_t, b_row)

    # (n, E) -> leading shape + (E,) is a contiguous row-major reshape (no copy).
    return jnp.reshape(out, lead_shape + (encode_dim,))


def _reference(x, freq, w, b, *, use_log=False):
    """Plain-JAX mirror of the PyTorch forward (for correctness checks)."""
    x = jnp.asarray(x, jnp.float32)
    if use_log:
        x = _normed_log(x)
    if x.ndim == 0:
        x = x[None]
    if x.shape[-1] != 1:
        x = x[..., None]
    num_freq = freq.shape[0]
    angles = x * jnp.reshape(freq.astype(jnp.float32), (-1,))   # == x @ freq.T (K=1)
    feats = jnp.concatenate([jnp.cos(angles), jnp.sin(angles)], axis=-1)
    feats = feats / math.sqrt(2 * num_freq)
    return jnp.dot(feats, w.T, precision=jax.lax.Precision.HIGHEST) + b


if __name__ == "__main__":
    encode_dim = 32
    num_frequencies = 8       # keeps exp-spaced frequencies in a sane f32 range
    use_log = False
    ATOL = 5e-3               # sin/cos at large angles may differ slightly between
    RTOL = 5e-3               # the in-kernel and XLA transcendental expansions

    key = jax.random.PRNGKey(0)
    k_x, k_w, k_b, k_x1, k_xbig = jax.random.split(key, 5)

    # Parameter init exactly like the PyTorch module:
    #   freq = exp(arange(F))[:, None] * 2*pi
    freq = jnp.exp(jnp.arange(num_frequencies, dtype=jnp.float32))[:, None] * (2.0 * math.pi)
    #   nn.Linear default init: U(-1/sqrt(fan_in), 1/sqrt(fan_in))
    fan_in = 2 * num_frequencies
    bound = 1.0 / math.sqrt(fan_in)
    w = jax.random.uniform(k_w, (encode_dim, fan_in), jnp.float32, -bound, bound)
    b = jax.random.uniform(k_b, (encode_dim,), jnp.float32, -bound, bound)

    # 1) [*] input (batch=4, seq=8 of relative abundances)
    x = jax.random.uniform(k_x, (4, 8), jnp.float32)
    out = jax.block_until_ready(
        abundance_encoder_learned_fourier(x, freq, w, b, use_log=use_log))
    ref = _reference(x, freq, w, b, use_log=use_log)
    assert out.shape == (4, 8, encode_dim), out.shape
    assert jnp.allclose(out, ref, atol=ATOL, rtol=RTOL), float(jnp.max(jnp.abs(out - ref)))

    # 2) rank-0 input path (unsqueeze branch) -> (encode_dim,)
    x0 = jnp.asarray(0.3, jnp.float32)
    out0 = jax.block_until_ready(abundance_encoder_learned_fourier(x0, freq, w, b))
    ref0 = _reference(x0, freq, w, b)
    assert out0.shape == (encode_dim,), out0.shape
    assert jnp.allclose(out0, ref0, atol=ATOL, rtol=RTOL)

    # 3) [*, 1] input path (no extra unsqueeze)
    x1 = jax.random.uniform(k_x1, (8, 1), jnp.float32)
    out1 = jax.block_until_ready(abundance_encoder_learned_fourier(x1, freq, w, b))
    ref1 = _reference(x1, freq, w, b)
    assert out1.shape == (8, encode_dim), out1.shape
    assert jnp.allclose(out1, ref1, atol=ATOL, rtol=RTOL)

    # 4) larger N: exercises multi-block grid + in-kernel ragged tail
    #    (N=3500 -> tb=880, grid=4, last block clipped at the boundary)
    xbig = jax.random.uniform(k_xbig, (5, 700), jnp.float32)
    outb = jax.block_until_ready(abundance_encoder_learned_fourier(xbig, freq, w, b))
    refb = _reference(xbig, freq, w, b)
    assert outb.shape == (5, 700, encode_dim), outb.shape
    assert jnp.allclose(outb, refb, atol=ATOL, rtol=RTOL), float(jnp.max(jnp.abs(outb - refb)))

    print("KERNEL_OK")
</pallas_src>

<mosaic_0001>
module attributes {stable_mosaic.version = 11 : i64} {
  func.func @_fourier_proj_kernel(%arg0: i32, %arg1: memref<8x1xf32, #tpu.memory_space<vmem>>, %arg2: memref<1x8xf32, #tpu.memory_space<vmem>>, %arg3: memref<16x32xf32, #tpu.memory_space<vmem>>, %arg4: memref<1x32xf32, #tpu.memory_space<vmem>>, %arg5: memref<8x32xf32, #tpu.memory_space<vmem>>) attributes {dimension_semantics = [#tpu.dimension_semantics<parallel>], iteration_bounds = array<i64: 4>, scalar_prefetch = 0 : i64, scratch_operands = 0 : i64, tpu.core_type = #tpu.core_type<tc>, window_params = [{transform_indices = @transform_0, window_bounds = array<i64: 8, 1>}, {pipeline_mode = #tpu.pipeline_mode<synchronous>, transform_indices = @transform_1, window_bounds = array<i64: 1, 8>}, {pipeline_mode = #tpu.pipeline_mode<synchronous>, transform_indices = @transform_2, window_bounds = array<i64: 16, 32>}, {pipeline_mode = #tpu.pipeline_mode<synchronous>, transform_indices = @transform_3, window_bounds = array<i64: 1, 32>}, {transform_indices = @transform_4, window_bounds = array<i64: 8, 32>}]} {
    %c0 = arith.constant 0 : index
    %c0_0 = arith.constant 0 : index
    %0 = vector.load %arg1[%c0, %c0_0] : memref<8x1xf32, #tpu.memory_space<vmem>>, vector<8x1xf32>
    %c0_1 = arith.constant 0 : index
    %c0_2 = arith.constant 0 : index
    %1 = vector.load %arg2[%c0_1, %c0_2] : memref<1x8xf32, #tpu.memory_space<vmem>>, vector<1x8xf32>
    %2 = vector.broadcast %0 : vector<8x1xf32> to vector<8x8xf32>
    %3 = vector.broadcast %1 : vector<1x8xf32> to vector<8x8xf32>
    %4 = arith.mulf %2, %3 : vector<8x8xf32>
    %5 = math.cos %4 : vector<8x8xf32>
    %6 = math.sin %4 : vector<8x8xf32>
    %7 = tpu.concatenate %5, %6 in 1 : vector<8x8xf32>, vector<8x8xf32> -> vector<8x16xf32>
    %c0_3 = arith.constant 0 : index
    %c0_4 = arith.constant 0 : index
    %8 = vector.load %arg3[%c0_3, %c0_4] : memref<16x32xf32, #tpu.memory_space<vmem>>, vector<16x32xf32>
    %cst = arith.constant dense<0.000000e+00> : vector<8x32xf32>
    %9 = tpu.matmul %7, %8, %cst {dimension_numbers = #tpu.dot_dimension_numbers<[1], [0], [0], [1], [0, 0, 1, 1], [], []>, precision = #tpu.contract_precision<fp32>} : vector<8x16xf32>, vector<16x32xf32>, vector<8x32xf32> -> vector<8x32xf32>
    %c0_5 = arith.constant 0 : index
    %c0_6 = arith.constant 0 : index
    %10 = vector.load %arg4[%c0_5, %c0_6] : memref<1x32xf32, #tpu.memory_space<vmem>>, vector<1x32xf32>
    %11 = vector.broadcast %10 : vector<1x32xf32> to vector<8x32xf32>
    %12 = arith.addf %9, %11 : vector<8x32xf32>
    %c0_7 = arith.constant 0 : index
    %c0_8 = arith.constant 0 : index
    %13 = vector.load %arg5[%c0_7, %c0_8] : memref<8x32xf32, #tpu.memory_space<vmem>>, vector<8x32xf32>
    tpu.vector_store %arg5[%c0_7, %c0_8], %12 {strides = array<i32>} : memref<8x32xf32, #tpu.memory_space<vmem>>, vector<8x32xf32>,
    return
  }
  func.func @transform_0(%arg0: i32) -> (i32, i32) {
    %c0_i32 = arith.constant 0 : i32
    %c0_i32_0 = arith.constant 0 : i32
    return %arg0, %c0_i32 : i32, i32
  }
  func.func @transform_1(%arg0: i32) -> (i32, i32) {
    %c0_i32 = arith.constant 0 : i32
    %c0_i32_0 = arith.constant 0 : i32
    %c0_i32_1 = arith.constant 0 : i32
    return %c0_i32, %c0_i32_0 : i32, i32
  }
  func.func @transform_2(%arg0: i32) -> (i32, i32) {
    %c0_i32 = arith.constant 0 : i32
    %c0_i32_0 = arith.constant 0 : i32
    %c0_i32_1 = arith.constant 0 : i32
    return %c0_i32, %c0_i32_0 : i32, i32
  }
  func.func @transform_3(%arg0: i32) -> (i32, i32) {
    %c0_i32 = arith.constant 0 : i32
    %c0_i32_0 = arith.constant 0 : i32
    %c0_i32_1 = arith.constant 0 : i32
    return %c0_i32, %c0_i32_0 : i32, i32
  }
  func.func @transform_4(%arg0: i32) -> (i32, i32) {
    %c0_i32 = arith.constant 0 : i32
    %c0_i32_0 = arith.constant 0 : i32
    return %arg0, %c0_i32 : i32, i32
  }
}

</mosaic_0001>

<bundles_post_ra>
// kernel: abundance_encoder_learned_fourier.1
= control target key start
LH: loop header
LB: loop body
LE: loop exit
PB: predicated region body
PF: predicated region fallthrough
CT: control target
= control target key end

     0   :  { %9 = vsyncpa [#allocation3], 0  ;;  %s1385_s0 = inlined_call_operand.vmem [shape: f32[32,1], index: 0, kind: input, shape index: {}]   ;;  %s1386_s1 = inlined_call_operand.vmem [shape: f32[1,8], index: 1, kind: input, shape index: {}]   ;;  %s1387_s2 = inlined_call_operand.vmem [shape: f32[16,32], index: 2, kind: input, shape index: {}]   ;;  %s1388_s3 = inlined_call_operand.vmem [shape: f32[1,32], index: 3, kind: input, shape index: {}]   ;;  %s1389_s4 = inlined_call_operand.hbm [shape: f32[32,32], index: 4, kind: output, shape index: {}]  }
   0x1   :  { %11 = vsyncpa [#allocation3 + $0x1], 0  ;;  %s1235_s15 = smov 0   ;;  %s1237_s16 = smov 0  }
   0x2   :  { %s1239_s17 = smov 0   ;;  %s1241_s18 = smov 0  }
   0x3 LB: > { %s1256_s19 = sadd.s32 4294967295, %s1196_s18   ;;  %s967_s20 = sadd.s32 4294967294, %s1196_s18   ;;  %s1196_s18 = sphi %s1241_s18, %s1395_s18   ;;  %s1192_s17 = sphi %s1239_s17, %s1394_s17   ;;  %s1188_s16 = sphi %s1237_s16, %s1393_s16   ;;  %s1184_s15 = sphi %s1235_s15, %s1392_s15  }
   0x4   : > { %s1260_s21 = sadd.s32 1, %s1196_s18   ;;  %s113_s22 = sadd.s32 1, %s1192_s17 }
   0x5   : > { %s110_s23 = ssub.s32 %s1196_s18, %s1260_s21  ;;  %p123_p0 = scmp.ne.s32.totalorder %s1192_s17, %s1188_s16 }
   0x6   : > { %p111_p1 = scmp.eq.s32.totalorder %s110_s23, 0  ;;  %p124_p2 = scmp.eq.s32.totalorder %s1256_s19, 3 }
   0x7   : > { %p129_p3 = scmp.ne.s32.totalorder %s1188_s16, %s1184_s15  ;;  %p130_p4 = scmp.eq.s32.totalorder %s967_s20, 3 }
   0x8   : > { %s1271_s24 = scalar_select %p111_p1, %s1192_s17, %s113_s22  }
   0x9   : > { %p1273_p5 = por %p124_p2, %p123_p0  ;;  %p1277_p6 = por %p130_p4, %p129_p3 }
   0xa   : > { %p970_p7 = scmp.ge.s32.totalorder %s1196_s18, 1  ;;  %p164_p8 = scmp.lt.s32.totalorder %s1196_s18, 5 }
   0xc   : > { %p165_p9 = pnand %p970_p7, %p164_p8 }
   0xd   : > { %p189_p10 = scmp.lt.s32.totalorder (!%p165_p9), %s1256_s19, 3  ;;  %v1198_v0 = vmov (!%p165_p9), 0   ;;  %v973_v2 = vld [vmem:[%s1386_s1] ss:$0 sm:$0xff] (!%p165_p9)  ;;  %v1199_v15 = vmov (!%p165_p9), 683565275  }
   0xe   : > { %168 = sbr.rel (%p165_p9) target bundleno = 608 (0x260), region = 36  ;;  %1129 = vset.pattern.permute.xlu0 (!%p165_p9), %v1198_v0  ;;  %v1200_v17 = vmov (!%p165_p9), 2475754826   ;;  %v1201_v20 = vmov (!%p165_p9), 2131351028   ;;  %vm1206_vm9 = vmmov (!%p165_p9), 0  }
   0xf   : > { %v1202_v23 = vmov (!%p165_p9), 2102212464   ;;  %v1203_v26 = vmov (!%p165_p9), 920167782   ;;  %v1204_v29 = vmov (!%p165_p9), 1326507024  }
  0x10   : > { %s1208_s12 = smov (!%p165_p9), 8   ;;  %s186_s13 = sand.u32 (!%p165_p9), 1, %s1188_s16  }
  0x11   : > { %s971_s14 = sshll.u32 (!%p165_p9), %s186_s13, 3  ;;  %s984_s23 = sshll.u32 (!%p165_p9), %s1256_s19, 7 }
  0x12   : > { %s895_s6 = scalar_lea.sflag (!%p165_p9), [#allocation3], %s186_s13 }
  0x15   : > { %s190_s27 = scalar_select %p189_p10, %s1256_s19, 3 }
  0x16   : > { %s1209_s19 = smov [#allocation2]  }
  0x17   : > { %s972_s28 = sshll.u32 %s190_s27, 3  ;;  %s188_s27 = scalar_lea.vmem [#allocation2], %s971_s14 }
  0x18   : > { %s192_s5 = scalar_lea.vmem %s1385_s0, %s972_s28  ;;  %s908_s28 = sshll.u32 %s188_s27, 4  ;;  %s1345_s28 = int_to_ptr.vmem [resolvable:$true] %s908_s28 }
  0x19   : > { %v193_v1 = vld [vmem:[%s192_s5] sm:$0xff]  ;;  %s1343_s5 = scalar_lea.hbm %s1389_s4, %s984_s23  ;;  %s1134_s7 = scalar_lea.vmem %s1345_s28, 128 }
  0x1a   : > { %197 = vperm.xlu0 %1129, %v193_v1   ;;  %p1135_p11 = scmp.ne.s32.totalorder %s1345_s28, %s1134_s7  ;;  %s1138_s8 = sshll.u32 %s1209_s19, 4  ;;  %s1139_s8 = int_to_ptr.vmem [resolvable:$false] %s1138_s8 }
  0x1b   : > { %s1140_s9 = scalar_lea.vmem %s1139_s8, 256  ;;  %p1141_p0 = scmp.lt.s32.totalorder %s1345_s28, %s1139_s8 }
  0x1c   : > { %p1136_p12 = pnand %p1135_p11, %p1273_p5  ;;  %p1142_p1 = scmp.lt.s32.totalorder %s1140_s9, %s1134_s7 }
  0x1e   : > { %p1137_p13 = pneg %p1136_p12  ;;  %p1143_p2 = por %p1142_p1, %p1141_p0 }
  0x20   : > { %p1144_p3 = pnand %p1143_p2, %p1137_p13 }
  0x99   : > { %v198_v3 = vpop.permute.xlu0 %197 }
  0x9a   : > { %v1291_v4 = vmul.f32 %v973_v2, %v198_v3 }
  0x9c   : > { %v210_v5 = vand.u32 2139095040, %v1291_v4  ;;  %v207_v9 = vand.u32 2147483647, %v1291_v4  ;;  %vm209_vm7 = vcmp.lt.s32.totalorder %v1291_v4, 0 }
  0x9e   : > { %v211_v6 = vshrl.u32 %v210_v5, 23  ;;  %v214_v12 = vand.u32 8388607, %v207_v9  ;;  %vm208_vm8 = vcmp.le.f32.partialorder %v207_v9, 0.7853982 }
  0xa0   : > { %v974_v7 = vadd.s32 4294967169, %v211_v6  ;;  %v215_v31 = vor.u32 8388608, %v214_v12 }
  0xa2   : > { %v217_v8 = vadd.s32 1, %v974_v7  ;;  %v255_v45 = vshll.u32 %v215_v31, 8 }
  0xa4   : > { %vm218_vm0 = vcmp.gt.s32.totalorder %v217_v8, 0 }
  0xa5   : > { %v219_v10 = vsel %vm218_vm0, %v217_v8, 0  ;;  %vm299_vm0 = vweird.f32 %v1291_v4 }
  0xa6   : > { %v221_v11 = vand.u32 31, %v219_v10  ;;  %v220_v14 = vshrl.u32 %v219_v10, 5 }
  0xa8   : > { %v222_v13 = vsub.s32 32, %v221_v11  ;;  %v224_v16 = vshll.u32 %v1199_v15, %v221_v11  ;;  %v227_v18 = vshll.u32 %v1200_v17, %v221_v11  ;;  %v230_v22 = vshll.u32 %v1201_v20, %v221_v11 }
  0xa9   : > { %v233_v25 = vshll.u32 %v1202_v23, %v221_v11  ;;  %v236_v28 = vshll.u32 %v1203_v26, %v221_v11  ;;  %vm239_vm1 = vcmp.lt.s32.totalorder %v220_v14, 1  ;;  %vm242_vm2 = vcmp.lt.s32.totalorder %v220_v14, 4 }
  0xaa   : > { %v225_v19 = vshrl.u32 %v1200_v17, %v222_v13  ;;  %v228_v21 = vshrl.u32 %v1201_v20, %v222_v13  ;;  %v231_v24 = vshrl.u32 %v1202_v23, %v222_v13  ;;  %v234_v27 = vshrl.u32 %v1203_v26, %v222_v13  ;;  %v421_v26 = vld [vmem:[%s1387_s2 + $0x8] sm:$0xff] }
  0xab   : > { %v237_v30 = vshrl.u32 %v1204_v29, %v222_v13  ;;  %v223_v40 = vshrl.u32 %v1199_v15, %v222_v13  ;;  %vm241_vm3 = vcmp.lt.s32.totalorder %v220_v14, 3  ;;  %vm240_vm4 = vcmp.lt.s32.totalorder %v220_v14, 2 }
  0xac   : > { %v226_v32 = vor.u32 %v225_v19, %v224_v16  ;;  %v229_v33 = vor.u32 %v228_v21, %v227_v18  ;;  %v232_v34 = vor.u32 %v231_v24, %v230_v22  ;;  %v235_v35 = vor.u32 %v234_v27, %v233_v25  ;;  %v420_v25 = vld [vmem:[%s1387_s2] sm:$0xff] }
  0xad   : > { %v238_v36 = vor.u32 %v237_v30, %v236_v28  ;;  %v434_v27 = vand.u32 4294901760, %v420_v25  ;;  %v437_v28 = vand.u32 4294901760, %v421_v26 }
  0xae   : > { %v244_v37 = vsel %vm242_vm2, %v232_v34, 2102212464  ;;  %v247_v38 = vsel %vm239_vm1, %v226_v32, %v229_v33  ;;  %v251_v39 = vsel %vm239_vm1, %v229_v33, %v232_v34  ;;  %v248_v41 = vsel %vm242_vm2, %v235_v35, 920167782 }
  0xaf   : > { %v252_v42 = vsel %vm242_vm2, %v238_v36, 1326507024  ;;  %v249_v43 = vsel %vm241_vm3, %v232_v34, %v248_v41  ;;  %v243_v46 = vsel %vm239_vm1, %v223_v40, %v226_v32  ;;  %v245_v47 = vsel %vm241_vm3, %v229_v33, %v244_v37 }
  0xb0   : > { %v253_v44 = vsel %vm241_vm3, %v235_v35, %v252_v42  ;;  %v250_v48 = vsel %vm240_vm4, %v247_v38, %v249_v43  ;;  %v246_v54 = vsel %vm240_vm4, %v243_v46, %v245_v47  ;;  %v1048_v31 = vpack.c.bf16 %v437_v28, %v434_v27 }
  0xb1   : > { %v254_v49 = vsel %vm240_vm4, %v251_v39, %v253_v44  ;;  %v1300_v52 = vmul.u32.u64.low %v255_v45, %v250_v48  ;;  %v1301_v53 = vmul.u32.u64.high %v255_v45, %v250_v48, %v1300_v52  ;;  %v262_v56 = vmul.u32 %v255_v45, %v246_v54 }
  0xb2   : > { %v1297_v50 = vmul.u32.u64.low %v255_v45, %v254_v49  ;;  %v1298_v51 = vmul.u32.u64.high %v255_v45, %v254_v49, %v1297_v50  ;;  %v1317_v9 = vsub.f32 %v420_v25, %v434_v27  ;;  %v1319_v32 = vsub.f32 %v421_v26, %v437_v28 }
  0xb3   : > { %v265_v55 = vadd.s32 1, %v1301_v53  ;;  %v1205_v33 = vmov 0.0|0.0   ;;  %v1207_v35 = vmov 0.0   ;;  %vm418_vm1 = vcmask 64512  }
  0xb4   : > { %vm264_vm5 = vc.u32 %v1298_v51, %v1300_v52  ;;  %v263_v5 = vadd.s32 %v1300_v52, %v1298_v51  ;;  %1056 = vmatprep.subr.bf16.mxu0 %v1205_v33  ;;  %1047 = vmatprep.subr.bf16.mxu1 %v1205_v33  ;;  %v513_v43 = vand.u32 4294901760, %v1317_v9  ;;  %v520_v44 = vand.u32 4294901760, %v1319_v32 }
  0xb5   : > { %v266_v57 = vsel %vm264_vm5, %v265_v55, %v1301_v53  ;;  %1058 = vmatpush3.bf16.msra.mxu0 %v1048_v31  ;;  %1030 = vmatprep.mubr.msk.f32.mxu0 %vm1206_vm9, %v1207_v35  ;;  %v1054_v55 = vpack.c.bf16 %v1319_v32, %v1317_v9  ;;  %vm429_vm2 = vcmask 130048   ;;  %vm892_vm3 = vcmask 261120  }
  0xb6   : > { %v267_v58 = vadd.s32 %v266_v57, %v262_v56  ;;  %1049 = vmatpush3.bf16.msra.mxu1 %v1048_v31  ;;  %1009 = vmatprep.mubr.msk.f32.mxu1 %vm1206_vm9, %v1207_v35  ;;  %v514_v49 = vsub.f32 %v1317_v9, %v513_v43  ;;  %v521_v50 = vsub.f32 %v1319_v32, %v520_v44 }
  0xb7   : > { %1050 = vmatprep.subr.bf16.mxu1 %v1205_v33  ;;  %1059 = vmatprep.subr.bf16.mxu0 %v1205_v33  ;;  %v1060_v51 = vpack.c.bf16 %v520_v44, %v513_v43 }
  0xb8   : > { %v268_v59 = vadd.s32 536870912, %v267_v58  ;;  %v515_v52 = vand.u32 4294901760, %v514_v49  ;;  %v522_v53 = vand.u32 4294901760, %v521_v50 }
  0xba   : > { %v269_v60 = vshrl.u32 %v268_v59, 30  ;;  %v1051_v54 = vpack.c.bf16 %v522_v53, %v515_v52 }
  0xbc   : > { %v270_v61 = vshll.u32 %v269_v60, 30  ;;  %v293_v17 = vsub.s32 4, %v269_v60 }
  0xbe   : > { %v271_v62 = vsub.s32 %v267_v58, %v270_v61  ;;  %v294_v20 = vsel %vm209_vm7, %v293_v17, %v269_v60 }
  0xbf   : > { %v296_v23 = vsel %vm208_vm8, 0, %v294_v20 }
  0xc0   : > { %v273_v63 = vsub.s32 0, %v271_v62  ;;  %v403_v24 = vadd.s32 3, %v296_v23  ;;  %v300_v29 = vand.u32 3, %v296_v23 }
  0xc2   : > { %v975_v0 = vmin.u32 %v273_v63, %v271_v62  ;;  %v404_v30 = vand.u32 3, %v403_v24  ;;  %vm301_vm10 = vcmp.lt.s32.totalorder %v300_v29, 2  ;;  %vm302_vm11 = vcmp.eq.s32.totalorder %v300_v29, 0 }
  0xc3   : > { %vm305_vm12 = vcmp.eq.s32.totalorder %v300_v29, 2 }
  0xc4   : > { %v275_v1 = vclz %v975_v0  ;;  %vm409_vm13 = vcmp.eq.s32.totalorder %v404_v30, 2  ;;  %vm405_vm14 = vcmp.lt.s32.totalorder %v404_v30, 2  ;;  %vm406_vm15 = vcmp.eq.s32.totalorder %v404_v30, 0 }
  0xc6   : > { %v976_v2 = vadd.s32 4294967294, %v275_v1  ;;  %v982_v1 = vld [vmem:[%s1388_s3] ss:$0 sm:$0xff] }
  0xc8   : > { %vm977_vm6 = vcmp.lt.s32.totalorder %v976_v2, 0 }
  0xc9   : > { %v278_v3 = vsel %vm977_vm6, 0, %v976_v2 }
  0xca   : > { %v279_v6 = vsub.s32 32, %v278_v3  ;;  %v283_v7 = vsub.s32 4294967266, %v278_v3  ;;  %v280_v8 = vshll.u32 %v271_v62, %v278_v3 }
  0xcc   : > { %v281_v10 = vshrl.u32 %v263_v5, %v279_v6  ;;  %v284_v11 = vadd.s32 127, %v283_v7 }
  0xce   : > { %v282_v12 = vor.u32 %v281_v10, %v280_v8  ;;  %v285_v13 = vshll.u32 %v284_v11, 23 }
  0xd0   : > { %v286_v14 = vor.u32 4788187, %v285_v13  ;;  %v289_v16 = vcvt.s32.f32 %v282_v12 }
  0xd2   : > { %v287_v15 = vand.u32 2147483647, %v286_v14 }
  0xd4   : > { %v290_v18 = vmul.f32 %v289_v16, %v287_v15 }
  0xd6   : > { %v291_v19 = vxor.u32 2147483648, %v290_v18 }
  0xd8   : > { %v292_v21 = vsel %vm209_vm7, %v291_v19, %v290_v18 }
  0xd9   : > { %v295_v22 = vsel %vm208_vm8, %v1291_v4, %v292_v21 }
  0xda   : > { %1130 = vcosq.f32 %v295_v22 }
  0xdb   : > { %1132 = vsinq.f32 %v295_v22 }
  0xe4   : > { %v1131_v34 = vpop.eup %1130 }
  0xe5   : > { %v1133_v36 = vpop.eup %1132  ;;  %v306_v37 = vxor.u32 2147483648, %v1131_v34 }
  0xe6   : > { %v303_v38 = vxor.u32 2147483648, %v1133_v36 }
  0xe7   : > { %v411_v39 = vsel %vm409_vm13, %v306_v37, %v1133_v36  ;;  %v307_v40 = vsel %vm305_vm12, %v306_v37, %v1133_v36 }
  0xe8   : > { %v408_v41 = vsel %vm406_vm15, %v1131_v34, %v303_v38  ;;  %v304_v42 = vsel %vm302_vm11, %v1131_v34, %v303_v38 }
  0xe9   : > { %v412_v45 = vsel %vm405_vm14, %v408_v41, %v411_v39  ;;  %v308_v46 = vsel %vm301_vm10, %v304_v42, %v307_v40 }
  0xea   : > { %v413_v47 = vsel %vm299_vm0, nan, %v412_v45  ;;  %v309_v48 = vsel %vm299_vm0, nan, %v308_v46 }
  0xeb   : > { %415 = vrot.lane.b32.xlu0 %v413_v47, %s1208_s12 }
 0x15d   : > { %v416_v4 = vpop.permute.xlu0 %415 }
 0x15e   : > { %v419_v56 = vsel %vm418_vm1, %v309_v48, %v416_v4 }
 0x15f   : > { %v431_v57 = vsel %vm429_vm2, %v419_v56, 0 }
 0x160   : > { %v500_v58 = vand.u32 4294901760, %v431_v57 }
 0x162   : > { %v501_v59 = vsub.f32 %v431_v57, %v500_v58 }
 0x164   : > { %v502_v60 = vand.u32 4294901760, %v501_v59 }
 0x166   : > { %1031 = vmatmul.mubr.f32.vlgmr.msra.gmra.mrb[0].mxu0 %v502_v60  ;;  %v503_v61 = vsub.f32 %v501_v59, %v502_v60 }
 0x167   : > { %1061 = vmatpush3.bf16.msra.mxu0 %v1060_v51  ;;  %1037 = vmatprep.mubr.msk.f32.mxu0 %vm1206_vm9, %v1207_v35 }
 0x168   : > { %v504_v62 = vand.u32 4294901760, %v503_v61  ;;  %1062 = vmatprep.subr.bf16.mxu0 %v1205_v33 }
 0x16a   : > { %1010 = vmatmul.mubr.f32.vlgmr.msra.gmra.mrb[0].mxu1 %v504_v62 }
 0x16b   : > { %1052 = vmatpush3.bf16.msra.mxu1 %v1051_v54  ;;  %1016 = vmatprep.mubr.msk.f32.mxu1 %vm1206_vm9, %v1207_v35 }
 0x16c   : > { %1053 = vmatprep.subr.bf16.mxu1 %v1205_v33 }
 0x16e   : > { %1038 = vmatmul.mubr.f32.vlgmr.msra.gmra.mrb[0].mxu0 %v500_v58 }
 0x16f   : > { %1064 = vmatpush3.bf16.msra.mxu0 %v1048_v31  ;;  %1044 = vmatprep.mubr.msk.f32.mxu0 %vm1206_vm9, %v1207_v35 }
 0x172   : > { %1017 = vmatmul.mubr.f32.vlgmr.msra.gmra.mrb[0].mxu1 %v500_v58 }
 0x173   : > { %1055 = vmatpush3.bf16.msra.mxu1 %v1054_v55  ;;  %1023 = vmatprep.mubr.msk.f32.mxu1 %vm1206_vm9, %v1207_v35 }
 0x176   : > { %1045 = vmatmul.mubr.f32.vlgmr.msra.gmra.mrb[0].mxu0 %v500_v58 }
 0x17a   : > { %1024 = vmatmul.mubr.f32.vlgmr.msra.gmra.mrb[0].mxu1 %v501_v59 }
 0x249   : > { %v888_v63 = vpop.f32.mrb[0].mxu0 }
 0x24a   : > { %v1046_v0 = vpop.f32.mrb[1].mxu0 }
 0x24d   : > { %v663_v2 = vpop.f32.mrb[0].mxu1 }
 0x24e   : > { %v1065_v3 = vadd.f32 %v982_v1, %v663_v2  ;;  %v1025_v5 = vpop.f32.mrb[1].mxu1 }
 0x250   : > { %v1066_v6 = vadd.f32 %v1065_v3, %v888_v63 }
 0x252   : > { %893 = vst.msk [vmem:[%s188_s27] sm:$0xff] %vm892_vm3, %v1066_v6 }
 0x253   : > { %1147 = shalt.err (!%p1144_p3)
}
 0x254   : > { %s1148_s10 = scalar_lea.hbm %s1343_s5, 128  ;;  %s1152_s13 = scalar_lea.hbm %s1389_s4, 512 }
 0x255   : > { %p1149_p4 = scmp.ne.s32.totalorder %s1343_s5, %s1148_s10  ;;  %p1153_p9 = scmp.lt.u32.totalorder %s1343_s5, %s1389_s4 }
 0x256   : > { %p1154_p10 = scmp.lt.u32.totalorder %s1152_s13, %s1148_s10  ;;  %p1156_p12 = scmp.lt.u32.totalorder %s1148_s10, %s1343_s5 }
 0x257   : > { %p1150_p7 = pnand %p1149_p4, %p1273_p5 }
 0x258   : > { %p1155_p11 = por %p1154_p10, %p1153_p9 }
 0x259   : > { %p1151_p8 = pneg %p1150_p7 }
 0x25a   : > { %p1157_p13 = por %p1156_p12, %p1155_p11 }
 0x25c   : > { %p1158_p0 = pnand %p1157_p13, %p1151_p8 }
 0x25e   : > { %1161 = shalt.err (!%p1158_p0)
}
 0x25f   : > { %1079 = dma.vmem_to_hbm [thread:$0]  (%p1273_p5), %s1345_s28, 128, %s1343_s5, %s895_s6  }
 0x260 PF: > { %p1085_p1 = scmp.ge.s32.totalorder %s1196_s18, 2  ;;  %s920_s22 = sand.u32 1, %s1184_s15  }
 0x261   : > { %s921_s23 = scalar_lea.sflag [#allocation3], %s920_s22 }
 0x262   : > { %p1082_p2 = pnand %p1085_p1, %p1277_p6 }
 0x264   : > { %1179 = dma.done.wait (!%p1082_p2), %s921_s23, 128  }
 0x265   : > { %1181 = vsyncadd (!%p1082_p2), %s921_s23, 4294967168  ;;  %p14_p3 = scmp.ge.s32.totalorder %s1260_s21, 6   ;;  %s1392_s15 = smov %s1188_s16 }
 0x266   : > { %s1393_s16 = smov %s1192_s17  ;;  %s1394_s17 = smov %s1271_s24 }
 0x267   : > { %s1395_s18 = smov %s1260_s21  ;;  %16 = sbr.rel (!%p14_p3) target bundleno = 3 (0x3), region = 71 }
 0x26e   :  { %926 = vsyncpa [#allocation3], 1 }
 0x26f   :  { %928 = vsyncpa [#allocation3 + $0x1], 1 }

</bundles_post_ra>
